<compile_context>
chip_gen: v7x
topology: tpu7x:2x2x1
jax: 0.10.0
libtpu: 0.0.40
codegen_flags: <defaults>
</compile_context>

<pallas_src>
from functools import partial

import jax
import jax.numpy as jnp
import numpy as np
from jax.experimental import pallas as pl
from jax.experimental.pallas import tpu as pltpu


# ---------------------------------------------------------------------------
# Kernel: one block-diagonal MXU dot + fused bias + single lane-dense store.
# ---------------------------------------------------------------------------
def _patch_embed_kernel(d_ref, v_ref, w_ref, b_ref, o_ref):
    # d_ref, v_ref : (K, tile_s)   channel-major input blocks (input dtype)
    # w_ref        : (2K, 576)     block-diagonal fused weight [[W_d,0],[0,W_v]]
    # b_ref        : (1, 576)      fused bias (f32)
    # o_ref        : (tile_s, 576) single full-width lane-dense store
    x = jnp.concatenate([d_ref[...], v_ref[...]], axis=0)        # (2K, tile_s)
    x = x.astype(w_ref.dtype)
    acc = jax.lax.dot_general(
        x, w_ref[...],
        dimension_numbers=(((0,), (0,)), ((), ())),              # contract channel axis
        preferred_element_type=jnp.float32)                      # (tile_s, 576)
    o_ref[...] = (acc + b_ref[...]).astype(o_ref.dtype)


# ---------------------------------------------------------------------------
# Layout / policy helpers (plain Python / JAX, fused into the surrounding jit)
# ---------------------------------------------------------------------------
def _to_channel_major(x, p):
    """'b c (h p1) (w p2) -> b (p1 p2 c) (h w)'.  Free view when p == 1."""
    b, c, H, W = x.shape
    if p == 1:
        return x.reshape(b, c, H * W)                 # contiguous -> no copy
    x = x.reshape(b, c, H // p, p, W // p, p)
    x = x.transpose(0, 3, 5, 1, 2, 4)                 # (b, p1, p2, c, h, w)
    return x.reshape(b, p * p * c, (H // p) * (W // p))


def _rearrange_rows(x, p):
    """'b c (h p1) (w p2) -> b (h w) (p1 p2 c)' (reference / einops form)."""
    b, c, H, W = x.shape
    x = x.reshape(b, c, H // p, p, W // p, p)
    x = x.transpose(0, 2, 4, 3, 5, 1)
    return x.reshape(b, (H // p) * (W // p), p * p * c)


def _make_fused_weight(wd, bd, wv, bv, compute_dtype):
    """Block-diagonal weight [[W_d, 0], [0, W_v]] + fused bias."""
    K, D1 = wd.shape
    D2 = wv.shape[1]
    Dout = D1 + D2
    w = jnp.zeros((2 * K, Dout), jnp.float32)
    w = w.at[:K, :D1].set(wd)
    w = w.at[K:, D1:].set(wv)
    b = jnp.concatenate([bd, bv], axis=-1)            # (1, Dout)
    return w.astype(compute_dtype), b.astype(jnp.float32)


def _chip_info():
    """Best-effort (TensorCores sharing the grid, physical VMEM bytes/core)."""
    cores, vmem = 1, 128 * 1024 * 1024                # v5e / v6e defaults
    try:
        kind = jax.devices()[0].device_kind.lower()
        if "v7" in kind or "7x" in kind:              # v7x: 2 TCs, 64 MiB/TC
            cores, vmem = 2, 64 * 1024 * 1024
    except Exception:
        pass
    try:
        vmem = int(pltpu.get_tpu_info().vmem_capacity_bytes)
    except Exception:
        pass
    return cores, vmem


def _choose_tile_s(S, requested, min_total_steps, batch, row_bytes, cap):
    """Largest spatial tile that fits the VMEM budget, rounded to a lane
    multiple, while keeping >= min_total_steps grid steps overall."""
    budget_rows = max(128, cap // max(1, 2 * row_bytes))     # 2x headroom
    t = min(requested, S, budget_rows)
    min_s_steps = -(-min_total_steps // max(1, batch))
    if min_s_steps > 1:
        t = min(t, -(-S // min_s_steps))
    if t >= S:
        return int(S)                                  # full dim always legal
    t = max(128, (t // 128) * 128)                     # lane-dim multiple
    return int(S) if t >= S else int(t)


# ---------------------------------------------------------------------------
# Forward
# ---------------------------------------------------------------------------
@partial(jax.jit,
         static_argnames=("patch_size", "tile_s", "compute_dtype", "out_dtype"))
def patch_embed_forward(d, v, params, patch_size, tile_s=4096,
                        compute_dtype=jnp.bfloat16, out_dtype=jnp.bfloat16):
    """Forward pass of PatchEmbed. Returns (b, num_patches, 512 + 64)."""
    d_cm = _to_channel_major(d, patch_size)            # (b, K, S)
    v_cm = _to_channel_major(v, patch_size)
    b, Kp, S = d_cm.shape

    w_fused, b_fused = _make_fused_weight(
        params["wd"], params["bd"], params["wv"], params["bv"], compute_dtype)
    K2, Dout = w_fused.shape                            # (2K, 576)

    cores, vmem_phys = _chip_info()
    cap = min(int(0.8 * vmem_phys), 100 * 1024 * 1024)  # ~51 MiB v7x, ~100 MiB v5e/v6e

    in_isz = d_cm.dtype.itemsize
    cmp_isz = jnp.dtype(compute_dtype).itemsize
    out_isz = jnp.dtype(out_dtype).itemsize
    row_bytes = (2 * Dout * out_isz                     # double-buffered output
                 + Dout * 4                             # f32 accumulator
                 + 4 * Kp * in_isz                      # 2 streams x 2 buffers input
                 + K2 * (in_isz + cmp_isz))             # concat + cast temporaries
    fixed_bytes = 2 * K2 * Dout * cmp_isz + 2 * Dout * 4

    t = _choose_tile_s(S, tile_s, min_total_steps=2 * cores, batch=b,
                       row_bytes=row_bytes, cap=cap - fixed_bytes)
    need = fixed_bytes + t * row_bytes
    vmem_limit = int(min(cap, max(int(2.5 * need), 32 * 1024 * 1024)))

    out = pl.pallas_call(
        _patch_embed_kernel,
        out_shape=jax.ShapeDtypeStruct((b, S, Dout), out_dtype),
        grid_spec=pltpu.PrefetchScalarGridSpec(
            num_scalar_prefetch=0,
            grid=(b, pl.cdiv(S, t)),                    # ragged last tile OK
            in_specs=[
                pl.BlockSpec((pl.Squeezed(), Kp, t), lambda ib, js: (ib, 0, js)),
                pl.BlockSpec((pl.Squeezed(), Kp, t), lambda ib, js: (ib, 0, js)),
                pl.BlockSpec((K2, Dout), lambda ib, js: (0, 0)),
                pl.BlockSpec((1, Dout), lambda ib, js: (0, 0)),
            ],
            out_specs=pl.BlockSpec((pl.Squeezed(), t, Dout),
                                   lambda ib, js: (ib, js, 0)),
        ),
        compiler_params=pltpu.CompilerParams(
            dimension_semantics=("parallel", "parallel"),
            vmem_limit_bytes=vmem_limit),
    )(d_cm, v_cm, w_fused, b_fused)

    return out                                          # (b, S, 576)


# ---------------------------------------------------------------------------
# Params
# ---------------------------------------------------------------------------
def init_params(key, in_channels, patch_size):
    """Deterministic init; Linear stored transposed (in, out) for x @ W + b."""
    patch_dim = in_channels * 2 * patch_size ** 2
    k1, k2, k3, k4 = jax.random.split(key, 4)
    bound = 1.0 / np.sqrt(patch_dim)
    wd = jax.random.uniform(k1, (patch_dim, 512), jnp.float32, -bound, bound)
    bd = jax.random.uniform(k2, (1, 512), jnp.float32, -bound, bound)
    wv = jax.random.uniform(k3, (patch_dim, 64), jnp.float32, -bound, bound)
    bv = jax.random.uniform(k4, (1, 64), jnp.float32, -bound, bound)
    return {"wd": wd, "bd": bd, "wv": wv, "bv": bv}


# ---------------------------------------------------------------------------
# Demo + correctness check
# ---------------------------------------------------------------------------
if __name__ == "__main__":
    # in_channels=8, patch_size=1 -> Linear in_features = 8*2*1 = 16, so the
    # inputs carry c = 16 channels; b=2, H=W=8 -> 64 patches per image.
    in_channels = 8
    patch_size = 1
    b, c, H, W = 2, in_channels * 2, 8, 8
    S = (H // patch_size) * (W // patch_size)

    key = jax.random.PRNGKey(0)
    kd, kv, kp = jax.random.split(key, 3)
    d = jax.random.normal(kd, (b, c, H, W), jnp.float32)
    v = jax.random.normal(kv, (b, c, H, W), jnp.float32)
    params = init_params(kp, in_channels, patch_size)

    # --- default (bf16 compute / bf16 out) path -----------------------------
    out_bf16 = patch_embed_forward(d, v, params, patch_size)
    out_bf16 = jax.block_until_ready(out_bf16)
    assert out_bf16.shape == (b, S, 512 + 64)

    dp = _rearrange_rows(d, patch_size).astype(jnp.bfloat16)
    vp = _rearrange_rows(v, patch_size).astype(jnp.bfloat16)
    ref_bf16 = jnp.concatenate(
        [jnp.dot(dp, params["wd"].astype(jnp.bfloat16),
                 preferred_element_type=jnp.float32) + params["bd"],
         jnp.dot(vp, params["wv"].astype(jnp.bfloat16),
                 preferred_element_type=jnp.float32) + params["bv"]],
        axis=-1).astype(jnp.bfloat16)
    np.testing.assert_allclose(np.asarray(out_bf16, dtype=np.float32),
                               np.asarray(ref_bf16, dtype=np.float32),
                               rtol=2e-2, atol=2e-2)

    # --- f32 path (tight check of the block-diagonal fused-weight math) -----
    out_f32 = patch_embed_forward(d, v, params, patch_size,
                                  compute_dtype=jnp.float32,
                                  out_dtype=jnp.float32)
    out_f32 = jax.block_until_ready(out_f32)
    dpf = _rearrange_rows(d, patch_size)
    vpf = _rearrange_rows(v, patch_size)
    ref_f32 = jnp.concatenate(
        [dpf @ params["wd"] + params["bd"][0],
         vpf @ params["wv"] + params["bv"][0]], axis=-1)
    np.testing.assert_allclose(np.asarray(out_f32), np.asarray(ref_f32),
                               rtol=2e-3, atol=2e-3)

    print("KERNEL_OK")
</pallas_src>

<mosaic_0001>
module attributes {stable_mosaic.version = 11 : i64} {
  func.func @_patch_embed_kernel(%arg0: i32, %arg1: i32, %arg2: memref<1x16x64xf32, #tpu.memory_space<vmem>>, %arg3: memref<1x16x64xf32, #tpu.memory_space<vmem>>, %arg4: memref<32x576xbf16, #tpu.memory_space<vmem>>, %arg5: memref<1x576xf32, #tpu.memory_space<vmem>>, %arg6: memref<1x64x576xbf16, #tpu.memory_space<vmem>>) attributes {dimension_semantics = [#tpu.dimension_semantics<parallel>, #tpu.dimension_semantics<parallel>], iteration_bounds = array<i64: 2, 1>, scalar_prefetch = 0 : i64, scratch_operands = 0 : i64, tpu.core_type = #tpu.core_type<tc>, window_params = [{transform_indices = @transform_0, window_bounds = array<i64: 1, 16, 64>}, {transform_indices = @transform_1, window_bounds = array<i64: 1, 16, 64>}, {pipeline_mode = #tpu.pipeline_mode<synchronous>, transform_indices = @transform_2, window_bounds = array<i64: 32, 576>}, {pipeline_mode = #tpu.pipeline_mode<synchronous>, transform_indices = @transform_3, window_bounds = array<i64: 1, 576>}, {transform_indices = @transform_4, window_bounds = array<i64: 1, 64, 576>}]} {
    %c0 = arith.constant 0 : index
    %c0_0 = arith.constant 0 : index
    %c0_1 = arith.constant 0 : index
    %0 = vector.load %arg2[%c0, %c0_0, %c0_1] : memref<1x16x64xf32, #tpu.memory_space<vmem>>, vector<1x16x64xf32>
    %1 = vector.shape_cast %0 : vector<1x16x64xf32> to vector<16x64xf32>
    %c0_2 = arith.constant 0 : index
    %c0_3 = arith.constant 0 : index
    %c0_4 = arith.constant 0 : index
    %2 = vector.load %arg3[%c0_2, %c0_3, %c0_4] : memref<1x16x64xf32, #tpu.memory_space<vmem>>, vector<1x16x64xf32>
    %3 = vector.shape_cast %2 : vector<1x16x64xf32> to vector<16x64xf32>
    %4 = tpu.concatenate %1, %3 in 0 : vector<16x64xf32>, vector<16x64xf32> -> vector<32x64xf32>
    %5 = arith.truncf %4 : vector<32x64xf32> to vector<32x64xbf16>
    %c0_5 = arith.constant 0 : index
    %c0_6 = arith.constant 0 : index
    %6 = vector.load %arg4[%c0_5, %c0_6] : memref<32x576xbf16, #tpu.memory_space<vmem>>, vector<32x576xbf16>
    %cst = arith.constant dense<0.000000e+00> : vector<64x576xf32>
    %7 = tpu.matmul %5, %6, %cst {dimension_numbers = #tpu.dot_dimension_numbers<[0], [0], [1], [1], [0, 1, 1, 1], [], []>} : vector<32x64xbf16>, vector<32x576xbf16>, vector<64x576xf32> -> vector<64x576xf32>
    %c0_7 = arith.constant 0 : index
    %c0_8 = arith.constant 0 : index
    %8 = vector.load %arg5[%c0_7, %c0_8] : memref<1x576xf32, #tpu.memory_space<vmem>>, vector<1x576xf32>
    %9 = vector.broadcast %8 : vector<1x576xf32> to vector<64x576xf32>
    %10 = arith.addf %7, %9 : vector<64x576xf32>
    %11 = arith.truncf %10 : vector<64x576xf32> to vector<64x576xbf16>
    %c0_9 = arith.constant 0 : index
    %c0_10 = arith.constant 0 : index
    %c0_11 = arith.constant 0 : index
    %12 = vector.load %arg6[%c0_9, %c0_10, %c0_11] : memref<1x64x576xbf16, #tpu.memory_space<vmem>>, vector<1x64x576xbf16>
    %13 = vector.shape_cast %12 : vector<1x64x576xbf16> to vector<64x576xbf16>
    %14 = vector.shape_cast %11 : vector<64x576xbf16> to vector<1x64x576xbf16>
    tpu.vector_store %arg6[%c0_9, %c0_10, %c0_11], %14 {strides = array<i32>} : memref<1x64x576xbf16, #tpu.memory_space<vmem>>, vector<1x64x576xbf16>,
    return
  }
  func.func @transform_0(%arg0: i32, %arg1: i32) -> (i32, i32, i32) {
    %c0_i32 = arith.constant 0 : i32
    %c0_i32_0 = arith.constant 0 : i32
    return %arg0, %c0_i32, %arg1 : i32, i32, i32
  }
  func.func @transform_1(%arg0: i32, %arg1: i32) -> (i32, i32, i32) {
    %c0_i32 = arith.constant 0 : i32
    %c0_i32_0 = arith.constant 0 : i32
    return %arg0, %c0_i32, %arg1 : i32, i32, i32
  }
  func.func @transform_2(%arg0: i32, %arg1: i32) -> (i32, i32) {
    %c0_i32 = arith.constant 0 : i32
    %c0_i32_0 = arith.constant 0 : i32
    %c0_i32_1 = arith.constant 0 : i32
    return %c0_i32, %c0_i32_0 : i32, i32
  }
  func.func @transform_3(%arg0: i32, %arg1: i32) -> (i32, i32) {
    %c0_i32 = arith.constant 0 : i32
    %c0_i32_0 = arith.constant 0 : i32
    %c0_i32_1 = arith.constant 0 : i32
    return %c0_i32, %c0_i32_0 : i32, i32
  }
  func.func @transform_4(%arg0: i32, %arg1: i32) -> (i32, i32, i32) {
    %c0_i32 = arith.constant 0 : i32
    %c0_i32_0 = arith.constant 0 : i32
    return %arg0, %arg1, %c0_i32 : i32, i32, i32
  }
}

</mosaic_0001>

<bundles_post_ra>
// kernel: patch_embed_forward.1
= control target key start
LH: loop header
LB: loop body
LE: loop exit
PB: predicated region body
PF: predicated region fallthrough
CT: control target
= control target key end

     0   :  { %9 = vsyncpa [#allocation3], 0  ;;  %s1376_s0 = inlined_call_operand.vmem [shape: f32[2,16,64], index: 0, kind: input, shape index: {}]   ;;  %s1377_s1 = inlined_call_operand.vmem [shape: f32[2,16,64], index: 1, kind: input, shape index: {}]   ;;  %s1378_s2 = inlined_call_operand.vmem [shape: bf16[32,576], index: 2, kind: input, shape index: {}]   ;;  %s1379_s3 = inlined_call_operand.vmem [shape: f32[1,576], index: 3, kind: input, shape index: {}]   ;;  %s1380_s4 = inlined_call_operand.hbm [shape: bf16[2,64,576], index: 4, kind: output, shape index: {}]  }
   0x1   :  { %11 = vsyncpa [#allocation3 + $0x1], 0  ;;  %s1147_s15 = smov 0   ;;  %s1149_s16 = smov 0  }
   0x2   :  { %s1151_s17 = smov 0   ;;  %s1153_s18 = smov 0  }
   0x3   :  { %s1155_s19 = smov 0   ;;  %s1157_s20 = smov 0  }
   0x4 LB: > { %s858_s21 = sadd.s32 4294967295, %s1116_s20   ;;  %s859_s22 = sadd.s32 4294967294, %s1116_s20   ;;  %s1116_s20 = sphi %s1157_s20, %s17_s20   ;;  %s1112_s19 = sphi %s1155_s19, %s1387_s19   ;;  %s1108_s18 = sphi %s1153_s18, %s1386_s18   ;;  %s1104_s17 = sphi %s1151_s17, %s1385_s17   ;;  %s1100_s16 = sphi %s1149_s16, %s1384_s16   ;;  %s1096_s15 = sphi %s1147_s15, %s1383_s15  }
   0x5   : > { %s29_s23 = sadd.s32 1, %s1112_s19  ;;  %s136_s24 = sadd.s32 1, %s1104_s17 }
   0x6   : > { %p31_p0 = scmp.ge.s32.totalorder %s29_s23, 2  ;;  %p146_p1 = scmp.ne.s32.totalorder %s1104_s17, %s1100_s16 }
   0x7   : > { %p147_p2 = scmp.eq.s32.totalorder %s858_s21, 1  ;;  %p152_p3 = scmp.ne.s32.totalorder %s1100_s16, %s1096_s15 }
   0x8   : > { %s1389_s23 = smov (%p31_p0, %s29_s23), 0  ;;  %p153_p5 = scmp.eq.s32.totalorder %s859_s22, 1 }
   0x9   : > { %p1187_p4 = por %p147_p2, %p146_p1  ;;  %s131_s26 = ssub.s32 %s1112_s19, %s1389_s23 }
   0xa   : > { %p862_p6 = scmp.ge.s32.totalorder %s1116_s20, 1  ;;  %p134_p7 = scmp.eq.s32.totalorder %s131_s26, 0 }
   0xb   : > { %p1194_p8 = por %p153_p5, %p152_p3  ;;  %p199_p9 = scmp.lt.s32.totalorder %s1116_s20, 3 }
   0xc   : > { %s1200_s28 = scalar_select %p134_p7, %s1104_s17, %s136_s24  }
   0xd   : > { %p200_p10 = pnand %p862_p6, %p199_p9 }
   0xe   : > { %p236_p11 = scmp.lt.s32.totalorder (!%p200_p10), %s1108_s18, 1  ;;  %v1024_v0 = vld [vmem:[%s1378_s2 + $0x4] ss:$20 sps:$4 sm:$0xff] (!%p200_p10)   ;;  %v1026_v1 = vld [vmem:[%s1378_s2] ss:$20 sps:$4 sm:$0xff] (!%p200_p10)   ;;  %v1118_v2 = vmov (!%p200_p10), 0   ;;  %v274_v21 = vlaneseq (!%p200_p10) }
   0xf   : > { %203 = sbr.rel (%p200_p10) target bundleno = 410 (0x19a), region = 36  ;;  %412 = vmatprep.mubr.bf16.mxu0 (!%p200_p10), %v1118_v2  ;;  %442 = vmatprep.mubr.bf16.mxu1 (!%p200_p10), %v1118_v2  ;;  %v1027_v3 = vld [vmem:[%s1378_s2 + $0x2c] ss:$20 sps:$4 sm:$0xff] (!%p200_p10)   ;;  %v1029_v4 = vld [vmem:[%s1378_s2 + $0x28] ss:$20 sps:$4 sm:$0xff] (!%p200_p10)   ;;  %vm367_vm0 = vcmask (!%p200_p10), 261120  }
  0x10   : > { %380 = vmatprep.subr.bf16.mxu0 (!%p200_p10), %v1024_v0  ;;  %960 = vmatprep.subr.bf16.mxu1 (!%p200_p10), %v1024_v0  ;;  %v1032_v5 = vld [vmem:[%s1378_s2 + $0xc] ss:$20 sps:$4 sm:$0xff] (!%p200_p10)   ;;  %v1033_v6 = vld [vmem:[%s1378_s2 + $0x10] ss:$20 sps:$4 sm:$0xff] (!%p200_p10)   ;;  %v1030_v17 = vld [vmem:[%s1378_s2 + $0x8] ss:$20 sps:$4 sm:$0xff] (!%p200_p10)  }
  0x11   : > { %381 = vmatpush1.bf16.msra.mxu0 (!%p200_p10), %v1026_v1  ;;  %962 = vmatpush1.bf16.msra.mxu1 (!%p200_p10), %v1026_v1  ;;  %v1037_v13 = vld [vmem:[%s1378_s2 + $0x38] ss:$20 sps:$4 sm:$0xff] (!%p200_p10)   ;;  %v1036_v18 = vld [vmem:[%s1378_s2 + $0x34] ss:$20 sps:$4 sm:$0xff] (!%p200_p10)   ;;  %v1034_v20 = vld [vmem:[%s1378_s2 + $0x30] ss:$20 sps:$4 sm:$0xff] (!%p200_p10)  }
  0x12   : > { %382 = vmatprep.subr.bf16.mxu0 (!%p200_p10), %v1027_v3  ;;  %961 = vmatprep.subr.bf16.mxu1 (!%p200_p10), %v1027_v3  ;;  %v1252_v22 = vshrl.u32 (!%p200_p10), %v274_v21, 7  ;;  %v272_v24 = vld [vmem:[%s1379_s3] sm:$0x1f] (!%p200_p10)  ;;  %vm721_vm1 = vcmask (!%p200_p10), 519168   ;;  %s1119_s10 = smov (!%p200_p10), [#allocation2]  }
  0x13   : > { %s1042_s11 = sshll.u32 (!%p200_p10), %s1119_s10, 4  ;;  %s1043_s11 = int_to_ptr.vmem [resolvable:$false] %s1042_s11 }
  0x14   : > { %v276_v23 = vsub.s32 (!%p200_p10), 0, %v1252_v22  ;;  %v280_v25 = vsub.s32 (!%p200_p10), 1, %v1252_v22  ;;  %v284_v50 = vsub.s32 (!%p200_p10), 2, %v1252_v22  ;;  %v288_v54 = vsub.s32 (!%p200_p10), 3, %v1252_v22  ;;  %s1044_s12 = scalar_lea.vmem (!%p200_p10), %s1043_s11, 5120 }
  0x15   : > { %383 = vmatpush1.bf16.msra.mxu0 (!%p200_p10), %v1029_v4  ;;  %963 = vmatpush1.bf16.msra.mxu1 (!%p200_p10), %v1029_v4  ;;  %v292_v63 = vsub.s32 (!%p200_p10), 4, %v1252_v22 }
  0x16   : > { %s237_s7 = scalar_select %p236_p11, %s1108_s18, 1  ;;  %453 = vmatprep.subr.bf16.mxu1 %v1032_v5  ;;  %948 = vmatprep.subr.bf16.mxu0 %v1033_v6  ;;  %v277_v26 = vrot.slane %v272_v24, %v276_v23  ;;  %v281_v27 = vrot.slane %v272_v24, %v280_v25  ;;  %v1270_v62 = vrot.slane %v272_v24, %v284_v50 }
  0x17   : > { %v1274_v3 = vrot.slane %v272_v24, %v288_v54 }
  0x18   : > { %s916_s14 = sshll.u32 %s237_s7, 4 }
  0x19   : > { %s243_s24 = scalar_lea.vmem %s1376_s0, %s916_s14  ;;  %s251_s30 = scalar_lea.vmem %s1377_s1, %s916_s14 }
  0x1a   : > { %v254_v7 = vld [vmem:[%s243_s24] sm:$0xff]  ;;  %v255_v8 = vld [vmem:[%s243_s24 + $0x8] sm:$0xff]  ;;  %s233_s24 = sand.u32 1, %s1100_s16  }
  0x1b   : > { %v256_v9 = vld [vmem:[%s251_s30] sm:$0xff]  ;;  %v258_v10 = vpack.c.bf16 %v255_v8, %v254_v7  ;;  %v257_v11 = vld [vmem:[%s251_s30 + $0x8] sm:$0xff]  ;;  %s964_s26 = smul.u32 160, %s233_s24 }
  0x1c   : > { %v259_v12 = vpack.c.bf16 %v257_v11, %v256_v9  ;;  %v293_v11 = vrot.slane %v272_v24, %v292_v63  ;;  %s965_s30 = smul.u32 2560, %s1108_s18  ;;  %s1330_s18 = scalar_lea.sflag [#allocation3], %s233_s24 }
  0x1d   : > { %299 = vxpose.xlu0.c.b16.start [1/2] (short) (narrow) %v258_v10, 64  ;;  %s1262_s29 = scalar_lea.vmem [#allocation2], %s964_s26 }
  0x1e   : > { %s761_s5 = sshll.u32 %s1262_s29, 4  ;;  %s1322_s8 = scalar_lea.hbm %s1380_s4, %s965_s30  ;;  %s1324_s5 = int_to_ptr.vmem [resolvable:$true] %s761_s5 }
  0x1f   : > { %s1038_s9 = scalar_lea.vmem %s1324_s5, 2560  ;;  %p1045_p1 = scmp.lt.s32.totalorder %s1324_s5, %s1043_s11 }
  0x20   : > { %p1039_p12 = scmp.ne.s32.totalorder %s1324_s5, %s1038_s9  ;;  %p1046_p2 = scmp.lt.s32.totalorder %s1044_s12, %s1038_s9 }
  0x21   : > { %300 = vxpose.xlu0.c.b16.end [2/2] (short) (narrow) %v259_v12, 64 }
  0x22   : > { %p1040_p13 = pnand %p1039_p12, %p1187_p4  ;;  %p1047_p3 = por %p1046_p2, %p1045_p1 }
  0x24   : > { %p1041_p0 = pneg %p1040_p13 }
  0x26   : > { %p1048_p5 = pnand %p1047_p3, %p1041_p0 }
  0x83   : > { %v307_v14 = vpop.trf.xlu0 }
  0x84   : > { %877 = vmatmul.mubr.msk.bf16.vlgmr.msra.gmra.mrb[0].mxu0 %vm367_vm0, %v307_v14 }
  0x85   : > { %422 = vmatprep.mubr.bf16.mxu0 %v1118_v2  ;;  %949 = vmatpush3.bf16.msra.mxu0 %v1033_v6 }
  0x86   : > { %950 = vmatprep.subr.bf16.mxu0 %v1037_v13 }
  0x87   : > { %v308_v15 = vpop.trf.xlu0 }
  0x89   : > { %951 = vmatpush3.bf16.msra.mxu0 %v1037_v13 }
  0x8b   : > { %v309_v16 = vpop.trf.xlu0 }
  0x8c   : > { %878 = vmatmul.mubr.msk.bf16.gmra.mrb[4].mxu0 %vm367_vm0, %v308_v15 }
  0x8d   : > { %432 = vmatprep.mubr.bf16.mxu0 %v1118_v2 }
  0x8f   : > { %v310_v19 = vpop.trf.xlu0 }
  0x90   : > { %880 = vmatmul.mubr.msk.bf16.vlgmr.msra.gmra.mrb[0].mxu1 %vm367_vm0, %v310_v19 }
  0x91   : > { %454 = vmatpush1.bf16.msra.mxu1 %v1030_v17  ;;  %485 = vmatprep.mubr.bf16.mxu1 %v1118_v2 }
  0x92   : > { %455 = vmatprep.subr.bf16.mxu1 %v1036_v18 }
  0x94   : > { %879 = vmatmul.mubr.msk.bf16.gmra.mrb[8].mxu0 %vm367_vm0, %v309_v16 }
  0x95   : > { %456 = vmatpush1.bf16.msra.mxu1 %v1034_v20  ;;  %952 = vmatprep.mubr.msk.bf16.mxu0 %vm367_vm0, %v307_v14 }
  0x98   : > { %881 = vmatmul.mubr.msk.bf16.vlgmr.msra.gmra.mrb[4].mxu1 %vm367_vm0, %v307_v14 }
  0x99   : > { %495 = vmatprep.mubr.bf16.mxu1 %v1118_v2 }
  0x9c   : > { %953 = vmatmul.mubr.msk.bf16.vlgmr.msra.gmra.mrb[12].mxu0 %vm367_vm0, %v308_v15 }
  0x9d   : > { %956 = vmatprep.mubr.msk.bf16.mxu0 %vm367_vm0, %v309_v16 }
  0xa0   : > { %882 = vmatmul.mubr.msk.bf16.gmra.mrb[8].mxu1 %vm367_vm0, %v308_v15 }
  0xa1   : > { %505 = vmatprep.mubr.bf16.mxu1 %v1118_v2 }
  0xa4   : > { %957 = vmatmul.mubr.msk.bf16.gmra.mrb[16].mxu0 %vm367_vm0, %v310_v19 }
  0xa8   : > { %883 = vmatmul.mubr.msk.bf16.gmra.mrb[12].mxu1 %vm367_vm0, %v309_v16 }
  0xa9   : > { %515 = vmatprep.mubr.bf16.mxu1 %v1118_v2 }
  0xb0   : > { %884 = vmatmul.mubr.msk.bf16.gmra.mrb[16].mxu1 %vm367_vm0, %v310_v19 }
 0x157   : > { %v414_v28 = vpop.f32.mrb[0].mxu0 }
 0x158   : > { %v415_v29 = vadd.f32 %v414_v28, %v277_v26  ;;  %v416_v30 = vpop.f32.mrb[1].mxu0 }
 0x159   : > { %v417_v31 = vadd.f32 %v416_v30, %v281_v27  ;;  %v418_v32 = vpop.f32.mrb[2].mxu0 }
 0x15a   : > { %v419_v33 = vadd.f32 %v418_v32, %v277_v26  ;;  %v420_v34 = vpop.f32.mrb[3].mxu0 }
 0x15b   : > { %v918_v35 = vpack.c.bf16 %v417_v31, %v415_v29  ;;  %v421_v36 = vadd.f32 %v420_v34, %v281_v27 }
 0x15d   : > { %719 = vst [vmem:[%s1262_s29] sm:$0xff] %v918_v35  ;;  %v921_v37 = vpack.c.bf16 %v421_v36, %v419_v33 }
 0x15f   : > { %723 = vst [vmem:[%s1262_s29 + $0x14] sm:$0xff] %v921_v37  ;;  %v424_v38 = vpop.f32.mrb[4].mxu0 }
 0x160   : > { %v425_v39 = vadd.f32 %v424_v38, %v277_v26  ;;  %v426_v40 = vpop.f32.mrb[5].mxu0 }
 0x161   : > { %v427_v41 = vadd.f32 %v426_v40, %v281_v27  ;;  %v428_v42 = vpop.f32.mrb[6].mxu0 }
 0x162   : > { %v429_v43 = vadd.f32 %v428_v42, %v277_v26  ;;  %v430_v44 = vpop.f32.mrb[7].mxu0 }
 0x163   : > { %v924_v45 = vpack.c.bf16 %v427_v41, %v425_v39  ;;  %v431_v46 = vadd.f32 %v430_v44, %v281_v27  ;;  %v444_v47 = vpop.f32.mrb[0].mxu1 }
 0x164   : > { %v445_v48 = vadd.f32 %v444_v47, %v277_v26  ;;  %v446_v49 = vpop.f32.mrb[1].mxu1 }
 0x165   : > { %726 = vst [vmem:[%s1262_s29 + $0x28] sm:$0xff] %v924_v45  ;;  %v927_v51 = vpack.c.bf16 %v431_v46, %v429_v43  ;;  %v447_v52 = vadd.f32 %v446_v49, %v281_v27  ;;  %v448_v53 = vpop.f32.mrb[2].mxu1 }
 0x166   : > { %v449_v55 = vadd.f32 %v448_v53, %v277_v26  ;;  %v450_v56 = vpop.f32.mrb[3].mxu1 }
 0x167   : > { %729 = vst [vmem:[%s1262_s29 + $0x3c] sm:$0xff] %v927_v51  ;;  %v936_v57 = vpack.c.bf16 %v447_v52, %v445_v48  ;;  %v451_v58 = vadd.f32 %v450_v56, %v281_v27  ;;  %v434_v59 = vpop.f32.mrb[8].mxu0 }
 0x168   : > { %v435_v60 = vadd.f32 %v434_v59, %v277_v26  ;;  %v436_v61 = vpop.f32.mrb[9].mxu0 }
 0x169   : > { %738 = vst [vmem:[%s1262_s29 + $0x78] sm:$0xff] %v936_v57  ;;  %v939_v0 = vpack.c.bf16 %v451_v58, %v449_v55  ;;  %v437_v1 = vadd.f32 %v436_v61, %v281_v27  ;;  %v438_v2 = vpop.f32.mrb[10].mxu0 }
 0x16a   : > { %v439_v4 = vadd.f32 %v438_v2, %v277_v26  ;;  %v440_v5 = vpop.f32.mrb[11].mxu0 }
 0x16b   : > { %741 = vst [vmem:[%s1262_s29 + $0x8c] sm:$0xff] %v939_v0  ;;  %v930_v6 = vpack.c.bf16 %v437_v1, %v435_v60  ;;  %v441_v7 = vadd.f32 %v440_v5, %v281_v27  ;;  %v487_v8 = vpop.f32.mrb[4].mxu1 }
 0x16c   : > { %v488_v9 = vadd.f32 %v487_v8, %v1270_v62  ;;  %v489_v10 = vpop.f32.mrb[5].mxu1 }
 0x16d   : > { %732 = vst [vmem:[%s1262_s29 + $0x50] sm:$0xff] %v930_v6  ;;  %v933_v12 = vpack.c.bf16 %v441_v7, %v439_v4  ;;  %v490_v13 = vadd.f32 %v489_v10, %v1274_v3  ;;  %v491_v14 = vpop.f32.mrb[6].mxu1 }
 0x16e   : > { %v492_v15 = vadd.f32 %v491_v14, %v1270_v62  ;;  %v493_v16 = vpop.f32.mrb[7].mxu1 }
 0x16f   : > { %735 = vst [vmem:[%s1262_s29 + $0x64] sm:$0xff] %v933_v12  ;;  %v919_v17 = vpack.c.bf16 %v490_v13, %v488_v9  ;;  %v494_v18 = vadd.f32 %v493_v16, %v1274_v3  ;;  %v954_v19 = vpop.f32.mrb[12].mxu0 }
 0x170   : > { %v569_v20 = vadd.f32 %v954_v19, %v293_v11  ;;  %v560_v21 = vpop.f32.mrb[13].mxu0 }
 0x171   : > { %720 = vst [vmem:[%s1262_s29 + $0x8] sm:$0xff] %v919_v17  ;;  %v922_v22 = vpack.c.bf16 %v494_v18, %v492_v15  ;;  %v561_v23 = vadd.f32 %v560_v21, %v293_v11  ;;  %v955_v24 = vpop.f32.mrb[14].mxu0 }
 0x172   : > { %v926_v25 = vpack.c.bf16 %v569_v20, %v569_v20  ;;  %v572_v26 = vadd.f32 %v955_v24, %v293_v11  ;;  %v563_v27 = vpop.f32.mrb[15].mxu0 }
 0x173   : > { %724 = vst [vmem:[%s1262_s29 + $0x1c] sm:$0xff] %v922_v22  ;;  %v920_v28 = vpack.c.bf16 %v561_v23, %v561_v23  ;;  %v564_v29 = vadd.f32 %v563_v27, %v293_v11  ;;  %v497_v30 = vpop.f32.mrb[8].mxu1 }
 0x174   : > { %728 = vst.msk [vmem:[%s1262_s29 + $0x38] sm:$0xf] %vm721_vm1, %v926_v25  ;;  %v929_v31 = vpack.c.bf16 %v572_v26, %v572_v26  ;;  %v498_v32 = vadd.f32 %v497_v30, %v1270_v62  ;;  %v499_v33 = vpop.f32.mrb[9].mxu1 }
 0x175   : > { %722 = vst.msk [vmem:[%s1262_s29 + $0x10] sm:$0xf] %vm721_vm1, %v920_v28  ;;  %v923_v34 = vpack.c.bf16 %v564_v29, %v564_v29  ;;  %v500_v35 = vadd.f32 %v499_v33, %v1274_v3  ;;  %v501_v36 = vpop.f32.mrb[10].mxu1 }
 0x176   : > { %731 = vst.msk [vmem:[%s1262_s29 + $0x4c] sm:$0xf] %vm721_vm1, %v929_v31  ;;  %v502_v37 = vadd.f32 %v501_v36, %v1270_v62  ;;  %v503_v38 = vpop.f32.mrb[11].mxu1 }
 0x177   : > { %725 = vst.msk [vmem:[%s1262_s29 + $0x24] sm:$0xf] %vm721_vm1, %v923_v34  ;;  %v925_v39 = vpack.c.bf16 %v500_v35, %v498_v32  ;;  %v504_v40 = vadd.f32 %v503_v38, %v1274_v3  ;;  %v958_v41 = vpop.f32.mrb[16].mxu0 }
 0x178   : > { %v585_v42 = vadd.f32 %v958_v41, %v293_v11  ;;  %v576_v43 = vpop.f32.mrb[17].mxu0 }
 0x179   : > { %727 = vst [vmem:[%s1262_s29 + $0x30] sm:$0xff] %v925_v39  ;;  %v928_v44 = vpack.c.bf16 %v504_v40, %v502_v37  ;;  %v577_v45 = vadd.f32 %v576_v43, %v293_v11  ;;  %v959_v46 = vpop.f32.mrb[18].mxu0 }
 0x17a   : > { %v938_v47 = vpack.c.bf16 %v585_v42, %v585_v42  ;;  %v588_v48 = vadd.f32 %v959_v46, %v293_v11  ;;  %v579_v49 = vpop.f32.mrb[19].mxu0 }
 0x17b   : > { %730 = vst [vmem:[%s1262_s29 + $0x44] sm:$0xff] %v928_v44  ;;  %v932_v50 = vpack.c.bf16 %v577_v45, %v577_v45  ;;  %v580_v51 = vadd.f32 %v579_v49, %v293_v11  ;;  %v507_v52 = vpop.f32.mrb[12].mxu1 }
 0x17c   : > { %740 = vst.msk [vmem:[%s1262_s29 + $0x88] sm:$0xf] %vm721_vm1, %v938_v47  ;;  %v941_v53 = vpack.c.bf16 %v588_v48, %v588_v48  ;;  %v508_v54 = vadd.f32 %v507_v52, %v1270_v62  ;;  %v509_v55 = vpop.f32.mrb[13].mxu1 }
 0x17d   : > { %734 = vst.msk [vmem:[%s1262_s29 + $0x60] sm:$0xf] %vm721_vm1, %v932_v50  ;;  %v935_v56 = vpack.c.bf16 %v580_v51, %v580_v51  ;;  %v510_v57 = vadd.f32 %v509_v55, %v1274_v3  ;;  %v511_v58 = vpop.f32.mrb[14].mxu1 }
 0x17e   : > { %743 = vst.msk [vmem:[%s1262_s29 + $0x9c] sm:$0xf] %vm721_vm1, %v941_v53  ;;  %v512_v59 = vadd.f32 %v511_v58, %v1270_v62  ;;  %v513_v60 = vpop.f32.mrb[15].mxu1 }
 0x17f   : > { %737 = vst.msk [vmem:[%s1262_s29 + $0x74] sm:$0xf] %vm721_vm1, %v935_v56  ;;  %v931_v61 = vpack.c.bf16 %v510_v57, %v508_v54  ;;  %v514_v63 = vadd.f32 %v513_v60, %v1274_v3 }
 0x181   : > { %733 = vst [vmem:[%s1262_s29 + $0x58] sm:$0xff] %v931_v61  ;;  %v934_v0 = vpack.c.bf16 %v514_v63, %v512_v59 }
 0x183   : > { %736 = vst [vmem:[%s1262_s29 + $0x6c] sm:$0xff] %v934_v0  ;;  %v517_v1 = vpop.f32.mrb[16].mxu1 }
 0x184   : > { %v518_v2 = vadd.f32 %v517_v1, %v1270_v62  ;;  %v519_v4 = vpop.f32.mrb[17].mxu1 }
 0x185   : > { %v520_v5 = vadd.f32 %v519_v4, %v1274_v3  ;;  %v521_v6 = vpop.f32.mrb[18].mxu1 }
 0x186   : > { %v522_v7 = vadd.f32 %v521_v6, %v1270_v62  ;;  %v523_v8 = vpop.f32.mrb[19].mxu1 }
 0x187   : > { %v937_v9 = vpack.c.bf16 %v520_v5, %v518_v2  ;;  %v524_v10 = vadd.f32 %v523_v8, %v1274_v3 }
 0x189   : > { %739 = vst [vmem:[%s1262_s29 + $0x80] sm:$0xff] %v937_v9  ;;  %v940_v11 = vpack.c.bf16 %v524_v10, %v522_v7 }
 0x18b   : > { %742 = vst [vmem:[%s1262_s29 + $0x94] sm:$0xff] %v940_v11 }
 0x18c   : > { %1051 = shalt.err (!%p1048_p5)
}
 0x18d   : > { %s1052_s13 = scalar_lea.hbm %s1322_s8, 2560  ;;  %s1056_s22 = scalar_lea.hbm %s1380_s4, 5120 }
 0x18e   : > { %p1053_p6 = scmp.ne.s32.totalorder %s1322_s8, %s1052_s13  ;;  %p1057_p10 = scmp.lt.u32.totalorder %s1322_s8, %s1380_s4 }
 0x18f   : > { %p1058_p11 = scmp.lt.u32.totalorder %s1056_s22, %s1052_s13  ;;  %p1060_p13 = scmp.lt.u32.totalorder %s1052_s13, %s1322_s8 }
 0x190   : > { %p1054_p7 = pnand %p1053_p6, %p1187_p4 }
 0x191   : > { %p1059_p12 = por %p1058_p11, %p1057_p10 }
 0x192   : > { %p1055_p9 = pneg %p1054_p7 }
 0x193   : > { %p1061_p0 = por %p1060_p13, %p1059_p12 }
 0x195   : > { %p1062_p1 = pnand %p1061_p0, %p1055_p9 }
 0x197   : > { %1065 = shalt.err (!%p1062_p1)
}
 0x198   : > { %s1120_s29 = smov 320   ;;  %s1121_s30 = smov 20  }
 0x199   : > { %966 = dma.vmem_to_hbm [thread:$0]  (%p1187_p4), %s1324_s5, 2560, %s1322_s8, %s1330_s18, %s1120_s29, %s1120_s29, %s1121_s30  }
 0x19a PF: > { %p972_p2 = scmp.ge.s32.totalorder %s1116_s20, 2  ;;  %s776_s6 = sand.u32 1, %s1096_s15  }
 0x19b   : > { %s777_s7 = scalar_lea.sflag [#allocation3], %s776_s6 }
 0x19c   : > { %p969_p3 = pnand %p972_p2, %p1194_p8 }
 0x19e   : > { %1091 = dma.done.wait (!%p969_p3), %s777_s7, 2560  }
 0x19f   : > { %1093 = vsyncadd (!%p969_p3), %s777_s7, 4294964736  ;;  %s17_s20 = sadd.s32 1, %s1116_s20   ;;  %s1383_s15 = smov %s1100_s16 }
 0x1a0   : > { %p14_p5 = scmp.ge.s32.totalorder %s17_s20, 4   ;;  %s1384_s16 = smov %s1104_s17 }
 0x1a1   : > { %s1385_s17 = smov %s1200_s28  ;;  %s1386_s18 = smov %s1112_s19 }
 0x1a2   : > { %s1387_s19 = smov %s1389_s23  ;;  %16 = sbr.rel (!%p14_p5) target bundleno = 4 (0x4), region = 74 }
 0x1a9   :  { %782 = vsyncpa [#allocation3], 1 }
 0x1aa   :  { %784 = vsyncpa [#allocation3 + $0x1], 1 }

</bundles_post_ra>
